<compile_context>
chip_gen: v7x
topology: tpu7x:2x2x1
jax: 0.10.0
libtpu: 0.0.40
codegen_flags: <defaults>
</compile_context>

<pallas_src>
import functools

import jax
import jax.numpy as jnp
from jax.experimental import pallas as pl
from jax.experimental.pallas import tpu as pltpu


TRUNK_A = 256   # a1 (200 cols) zero-padded up to a 128-lane boundary
TRUNK_W = 384   # [a1 | pad | c1 | pad | const-1] ; col TRUNK_W-1 == 1.0
HEAD_W = 128    # lane-dense packed output: [mu | sigma | value | pad]


def _relu6(z):
    return jnp.clip(z, 0.0, 6.0)


def _softplus(z):
    # numerically stable softplus: max(z,0) + log1p(exp(-|z|))
    return jnp.maximum(z, 0.0) + jnp.log1p(jnp.exp(-jnp.abs(z)))


def net_kernel(x1_ref, wtrunk_ref, whead_ref, out_ref, *, a_dim):
    # x1: (B, s_dim+1), last column is constant 1 (bias folded into the MXU).
    x1 = x1_ref[...]

    # Fused actor+critic trunk: one MXU issue instead of two.
    trunk = jnp.dot(x1, wtrunk_ref[...], preferred_element_type=jnp.float32)  # (B, 384)
    trunk = _relu6(trunk)   # padding stays 0, const-1 bias lane stays 1

    # Fused mu/sigma/value heads (biases included via the const-1 lane):
    head = jnp.dot(trunk, whead_ref[...], preferred_element_type=jnp.float32)  # (B, 128)

    # Per-lane activation select on a single lane-dense vreg block:
    #   lanes [0, a_dim)        -> 2*tanh        (mu)
    #   lanes [a_dim, 2*a_dim)  -> softplus+1e-3 (sigma)
    #   lane  2*a_dim           -> identity      (value)
    lane = jax.lax.broadcasted_iota(jnp.int32, head.shape, 1)
    mu_act = 2.0 * jnp.tanh(head)
    sg_act = _softplus(head) + 0.001
    out_ref[...] = jnp.where(lane < a_dim, mu_act,
                             jnp.where(lane < 2 * a_dim, sg_act, head))


def pack_params(params, s_dim, a_dim):
    """Pack the five Linear layers into two MXU-friendly matrices (done once)."""
    assert 2 * a_dim + 1 <= HEAD_W, "a_dim too large for the packed head layout"
    f32 = jnp.float32

    w_trunk = jnp.zeros((s_dim + 1, TRUNK_W), f32)
    w_trunk = w_trunk.at[:s_dim, 0:200].set(params["w_a1"].astype(f32))
    w_trunk = w_trunk.at[:s_dim, TRUNK_A:TRUNK_A + 100].set(params["w_c1"].astype(f32))
    w_trunk = w_trunk.at[s_dim, 0:200].set(params["b_a1"][0].astype(f32))
    w_trunk = w_trunk.at[s_dim, TRUNK_A:TRUNK_A + 100].set(params["b_c1"][0].astype(f32))
    w_trunk = w_trunk.at[s_dim, TRUNK_W - 1].set(1.0)   # constant-1 lane for head biases

    w_head = jnp.zeros((TRUNK_W, HEAD_W), f32)
    w_head = w_head.at[0:200, 0:a_dim].set(params["w_mu"].astype(f32))
    w_head = w_head.at[0:200, a_dim:2 * a_dim].set(params["w_sigma"].astype(f32))
    w_head = w_head.at[TRUNK_A:TRUNK_A + 100, 2 * a_dim:2 * a_dim + 1].set(
        params["w_v"].astype(f32))
    w_head = w_head.at[TRUNK_W - 1, 0:a_dim].set(params["b_mu"][0].astype(f32))
    w_head = w_head.at[TRUNK_W - 1, a_dim:2 * a_dim].set(params["b_sigma"][0].astype(f32))
    w_head = w_head.at[TRUNK_W - 1, 2 * a_dim].set(params["b_v"][0, 0].astype(f32))
    return w_trunk, w_head


def net_forward(x, w_trunk, w_head, a_dim):
    """Whole Net.forward in a single gridless pallas_call (everything in VMEM)."""
    B = x.shape[0]
    x1 = jnp.concatenate(
        [x.astype(jnp.float32), jnp.ones((B, 1), jnp.float32)], axis=1)

    vmem = pl.BlockSpec(memory_space=pltpu.MemorySpace.VMEM)
    out = pl.pallas_call(
        functools.partial(net_kernel, a_dim=a_dim),
        out_shape=jax.ShapeDtypeStruct((B, HEAD_W), jnp.float32),
        in_specs=[vmem, vmem, vmem],
        out_specs=vmem,
    )(x1, w_trunk, w_head)

    mu = out[:, :a_dim]
    sigma = out[:, a_dim:2 * a_dim]
    values = out[:, 2 * a_dim:2 * a_dim + 1]
    return mu, sigma, values


def init_params(key, s_dim, a_dim):
    """Deterministic init mimicking set_init (normal(0, 0.1) weights, zero bias).
    Weights stored pre-transposed as (in, out) so y = x @ W + b."""
    ks = jax.random.split(key, 5)

    def lin(k, fan_in, fan_out):
        w = jax.random.normal(k, (fan_in, fan_out), dtype=jnp.float32) * 0.1
        b = jnp.zeros((1, fan_out), dtype=jnp.float32)
        return w, b

    w_a1, b_a1 = lin(ks[0], s_dim, 200)
    w_mu, b_mu = lin(ks[1], 200, a_dim)
    w_sg, b_sg = lin(ks[2], 200, a_dim)
    w_c1, b_c1 = lin(ks[3], s_dim, 100)
    w_v, b_v = lin(ks[4], 100, 1)

    return {
        "w_a1": w_a1, "b_a1": b_a1,
        "w_mu": w_mu, "b_mu": b_mu,
        "w_sigma": w_sg, "b_sigma": b_sg,
        "w_c1": w_c1, "b_c1": b_c1,
        "w_v": w_v, "b_v": b_v,
    }


def net_forward_ref(x, p):
    a1 = _relu6(x @ p["w_a1"] + p["b_a1"])
    mu = 2.0 * jnp.tanh(a1 @ p["w_mu"] + p["b_mu"])
    sigma = _softplus(a1 @ p["w_sigma"] + p["b_sigma"]) + 0.001
    c1 = _relu6(x @ p["w_c1"] + p["b_c1"])
    values = c1 @ p["w_v"] + p["b_v"]
    return mu, sigma, values


# TODO(synk): choose_action (Normal sampling) and loss_func are training-loop
# utilities outside Net.forward; not implemented as Pallas kernels here.

if __name__ == "__main__":
    s_dim, a_dim, batch = 16, 4, 8
    key = jax.random.PRNGKey(0)
    k_param, k_x = jax.random.split(key)

    params = init_params(k_param, s_dim, a_dim)
    x = jax.random.normal(k_x, (batch, s_dim), dtype=jnp.float32)

    # Pack/pad the five Linear layers into two matrices once, outside the kernel.
    w_trunk, w_head = pack_params(params, s_dim, a_dim)

    mu, sigma, values = net_forward(x, w_trunk, w_head, a_dim)
    jax.block_until_ready((mu, sigma, values))

    mu_r, sigma_r, values_r = net_forward_ref(x, params)
    assert mu.shape == (batch, a_dim)
    assert sigma.shape == (batch, a_dim)
    assert values.shape == (batch, 1)
    assert jnp.allclose(mu, mu_r, atol=1e-4), "mu mismatch"
    assert jnp.allclose(sigma, sigma_r, atol=1e-4), "sigma mismatch"
    assert jnp.allclose(values, values_r, atol=1e-4), "values mismatch"

    print("KERNEL_OK")
</pallas_src>

<mosaic_0001>
module attributes {stable_mosaic.version = 11 : i64} {
  func.func @net_kernel(%arg0: memref<8x17xf32, #tpu.memory_space<vmem>>, %arg1: memref<17x384xf32, #tpu.memory_space<vmem>>, %arg2: memref<384x128xf32, #tpu.memory_space<vmem>>, %arg3: memref<8x128xf32, #tpu.memory_space<vmem>>) attributes {dimension_semantics = [], scalar_prefetch = 0 : i64, scratch_operands = 0 : i64, tpu.core_type = #tpu.core_type<tc>} {
    %c0 = arith.constant 0 : index
    %c0_0 = arith.constant 0 : index
    %0 = vector.load %arg0[%c0, %c0_0] : memref<8x17xf32, #tpu.memory_space<vmem>>, vector<8x17xf32>
    %c0_1 = arith.constant 0 : index
    %c0_2 = arith.constant 0 : index
    %1 = vector.load %arg1[%c0_1, %c0_2] : memref<17x384xf32, #tpu.memory_space<vmem>>, vector<17x384xf32>
    %cst = arith.constant dense<0.000000e+00> : vector<8x384xf32>
    %2 = tpu.matmul %0, %1, %cst {dimension_numbers = #tpu.dot_dimension_numbers<[1], [0], [0], [1], [0, 0, 1, 1], [], []>} : vector<8x17xf32>, vector<17x384xf32>, vector<8x384xf32> -> vector<8x384xf32>
    %cst_3 = arith.constant 0.000000e+00 : f32
    %cst_4 = arith.constant 6.000000e+00 : f32
    %3 = vector.broadcast %cst_3 : f32 to vector<8x384xf32>
    %4 = arith.maximumf %3, %2 : vector<8x384xf32>
    %5 = vector.broadcast %cst_4 : f32 to vector<8x384xf32>
    %6 = arith.minimumf %5, %4 : vector<8x384xf32>
    %c0_5 = arith.constant 0 : index
    %c0_6 = arith.constant 0 : index
    %7 = vector.load %arg2[%c0_5, %c0_6] : memref<384x128xf32, #tpu.memory_space<vmem>>, vector<384x128xf32>
    %cst_7 = arith.constant dense<0.000000e+00> : vector<8x128xf32>
    %8 = tpu.matmul %6, %7, %cst_7 {dimension_numbers = #tpu.dot_dimension_numbers<[1], [0], [0], [1], [0, 0, 1, 1], [], []>} : vector<8x384xf32>, vector<384x128xf32>, vector<8x128xf32> -> vector<8x128xf32>
    %9 = tpu.iota {dimensions = array<i32: 1>} : vector<8x128xi32>
    %10 = math.tanh %8 : vector<8x128xf32>
    %cst_8 = arith.constant 2.000000e+00 : f32
    %11 = vector.broadcast %cst_8 : f32 to vector<8x128xf32>
    %12 = arith.mulf %11, %10 : vector<8x128xf32>
    %cst_9 = arith.constant 0.000000e+00 : f32
    %13 = vector.broadcast %cst_9 : f32 to vector<8x128xf32>
    %14 = arith.maximumf %8, %13 : vector<8x128xf32>
    %15 = math.absf %8 : vector<8x128xf32>
    %cst_10 = arith.constant 0.000000e+00 : f32
    %16 = vector.broadcast %cst_10 : f32 to vector<8x128xf32>
    %17 = arith.subf %16, %15 : vector<8x128xf32>
    %18 = math.exp %17 : vector<8x128xf32>
    %19 = math.log1p %18 : vector<8x128xf32>
    %20 = arith.addf %14, %19 : vector<8x128xf32>
    %cst_11 = arith.constant 1.000000e-03 : f32
    %21 = vector.broadcast %cst_11 : f32 to vector<8x128xf32>
    %22 = arith.addf %20, %21 : vector<8x128xf32>
    %c4_i32 = arith.constant 4 : i32
    %23 = vector.broadcast %c4_i32 : i32 to vector<8x128xi32>
    %24 = arith.cmpi slt, %9, %23 : vector<8x128xi32>
    %c8_i32 = arith.constant 8 : i32
    %25 = vector.broadcast %c8_i32 : i32 to vector<8x128xi32>
    %26 = arith.cmpi slt, %9, %25 : vector<8x128xi32>
    %27 = arith.select %26, %22, %8 : vector<8x128xi1>, vector<8x128xf32>
    %28 = arith.select %24, %12, %27 : vector<8x128xi1>, vector<8x128xf32>
    %c0_12 = arith.constant 0 : index
    %c0_13 = arith.constant 0 : index
    %29 = vector.load %arg3[%c0_12, %c0_13] : memref<8x128xf32, #tpu.memory_space<vmem>>, vector<8x128xf32>
    tpu.vector_store %arg3[%c0_12, %c0_13], %28 {strides = array<i32>} : memref<8x128xf32, #tpu.memory_space<vmem>>, vector<8x128xf32>,
    return
  }
}

</mosaic_0001>

<bundles_post_ra>
// kernel: tpu_custom_call.1
= control target key start
LH: loop header
LB: loop body
LE: loop exit
PB: predicated region body
PF: predicated region fallthrough
CT: control target
= control target key end

     0   :  { %8 = vsyncpa [#allocation3], 0  ;;  %s828_s0 = inlined_call_operand.hbm [shape: f32[8,17], index: 0, kind: input, shape index: {}]   ;;  %s829_s1 = inlined_call_operand.hbm [shape: f32[17,384], index: 1, kind: input, shape index: {}]   ;;  %s830_s2 = inlined_call_operand.hbm [shape: f32[384,128], index: 2, kind: input, shape index: {}]   ;;  %s831_s3 = inlined_call_operand.hbm [shape: f32[8,128], index: 3, kind: output, shape index: {}]  }
   0x1   :  { %9 = vsyncpa [#allocation6], 0 }
   0x2   :  { %10 = vsyncpa [#allocation4], 0  ;;  %s733_s12 = smov [#allocation5]   ;;  %s639_s16 = scalar_lea.hbm %s829_s1, 1152 }
   0x3   :  { %s26_s13 = sshll.u32 %s733_s12, 4  ;;  %p640_p0 = scmp.ne.s32.totalorder %s829_s1, %s639_s16  ;;  %s27_s13 = int_to_ptr.vmem [resolvable:$true] %s26_s13 }
   0x4   :  { %p643_p1 = scmp.lt.u32.totalorder %s639_s16, %s829_s1 }
   0x6   :  { %p645_p2 = pnand %p643_p1, %p640_p0 }
   0x8   :  { %648 = shalt.err (!%p645_p2)
}
   0x9   :  { %s649_s21 = scalar_lea.vmem %s27_s13, 1152  ;;  %p654_p4 = scmp.lt.s32.totalorder %s27_s13, %s27_s13 }
   0xa   :  { %p650_p3 = scmp.ne.s32.totalorder %s27_s13, %s649_s21  ;;  %p655_p5 = scmp.lt.s32.totalorder %s649_s21, %s649_s21 }
   0xc   :  { %p656_p6 = por %p655_p5, %p654_p4 }
   0xe   :  { %p657_p7 = pnand %p656_p6, %p650_p3 }
  0x10   :  { %660 = shalt.err (!%p657_p7)
}
  0x11   :  { %s734_s22 = smov 384   ;;  %s735_s23 = smov 24  }
  0x12   :  { %32 = dma.hbm_to_vmem [thread:$0]  %s829_s1, 1152, %s27_s13, [#allocation6], %s734_s22, %s734_s22, %s735_s23  }
  0x13   :  { %s736_s26 = smov [#allocation2]   ;;  %s737_s28 = smov [#allocation7]  }
  0x14   :  { %s17_s27 = sshll.u32 %s736_s26, 4  ;;  %s38_s29 = sshll.u32 %s737_s28, 4  ;;  %s18_s27 = int_to_ptr.vmem [resolvable:$true] %s17_s27  ;;  %s39_s29 = int_to_ptr.vmem [resolvable:$true] %s38_s29 }
  0x15   :  { %s661_s5 = scalar_lea.hbm %s828_s0, 128 }
  0x16   :  { %p662_p8 = scmp.ne.s32.totalorder %s828_s0, %s661_s5  ;;  %p665_p9 = scmp.lt.u32.totalorder %s661_s5, %s828_s0 }
  0x18   :  { %p667_p10 = pnand %p665_p9, %p662_p8 }
  0x1a   :  { %670 = shalt.err (!%p667_p10)
}
  0x1b   :  { %s671_s1 = scalar_lea.vmem %s18_s27, 128  ;;  %p676_p12 = scmp.lt.s32.totalorder %s18_s27, %s18_s27 }
  0x1c   :  { %p672_p11 = scmp.ne.s32.totalorder %s18_s27, %s671_s1  ;;  %p677_p13 = scmp.lt.s32.totalorder %s671_s1, %s671_s1 }
  0x1e   :  { %p678_p0 = por %p677_p13, %p676_p12 }
  0x20   :  { %p679_p1 = pnand %p678_p0, %p672_p11 }
  0x22   :  { %682 = shalt.err (!%p679_p1)
}
  0x23   :  { %20 = dma.hbm_to_vmem [thread:$0]  %s828_s0, 128, %s18_s27, [#allocation3]  }
  0x24   :  { %s683_s14 = scalar_lea.hbm %s830_s2, 6144 }
  0x25   :  { %p684_p2 = scmp.ne.s32.totalorder %s830_s2, %s683_s14  ;;  %p687_p3 = scmp.lt.u32.totalorder %s683_s14, %s830_s2 }
  0x27   :  { %p689_p4 = pnand %p687_p3, %p684_p2 }
  0x29   :  { %692 = shalt.err (!%p689_p4)
}
  0x2a   :  { %s693_s19 = scalar_lea.vmem %s39_s29, 6144  ;;  %p698_p6 = scmp.lt.s32.totalorder %s39_s29, %s39_s29 }
  0x2b   :  { %p694_p5 = scmp.ne.s32.totalorder %s39_s29, %s693_s19  ;;  %p699_p7 = scmp.lt.s32.totalorder %s693_s19, %s693_s19 }
  0x2d   :  { %p700_p8 = por %p699_p7, %p698_p6 }
  0x2f   :  { %p701_p9 = pnand %p700_p8, %p694_p5 }
  0x31   :  { %704 = shalt.err (!%p701_p9)
}
  0x32   :  { %s738_s0 = smov 128   ;;  %s739_s20 = smov 8  }
  0x33   :  { %44 = dma.hbm_to_vmem [thread:$0]  %s830_s2, 6144, %s39_s29, [#allocation6], %s738_s0, %s738_s0, %s739_s20  }
  0x34   :  { %727 = dma.done.wait [#allocation3], 128  }
  0x35   :  { %728 = vsyncadd [#allocation3], 4294967168 }
  0x36   :  { %729 = dma.done.wait [#allocation6], 7296  }
  0x37   :  { %730 = vsyncadd [#allocation6], 4294960000  ;;  %v740_v0 = vmov 0.0|0.0   ;;  %v741_v1 = vmov 0.0   ;;  %vm742_vm0 = vmmov 0   ;;  %v56_v2 = vld [vmem:[#allocation5 + $0x8] sm:$0xff] }
  0x38   :  { %563 = vmatprep.subr.bf16.mxu1 %v740_v0  ;;  %142 = vmatprep.mubr.f32.mxu0 %v741_v1  ;;  %v59_v3 = vld [vmem:[#allocation5 + $0x20] sm:$0xff]  ;;  %v58_v6 = vld [vmem:[#allocation5 + $0x18] sm:$0xff]  ;;  %vm68_vm1 = vcmask 1040384   ;;  %v57_v9 = vld [vmem:[#allocation5 + $0x10] sm:$0xff]  ;;  %vm64_vm2 = vcmask 138240   ;;  %s743_s2 = smov [#allocation8]  }
  0x39   :  { %521 = vmatprep.mubr.msk.f32.mxu1 %vm742_vm0, %v741_v1  ;;  %v55_v4 = vld [vmem:[#allocation5] sm:$0xff]  ;;  %v559_v5 = vpack.c.bf16 %v59_v3, %v56_v2  ;;  %v62_v8 = vld [vmem:[#allocation5 + $0x38] sm:$0x1]  ;;  %v60_v10 = vld [vmem:[#allocation5 + $0x28] sm:$0xff]  ;;  %s444_s23 = sshll.u32 %s743_s2, 4  ;;  %s445_s23 = int_to_ptr.vmem [resolvable:$true] %s444_s23 }
  0x3a   :  { %v561_v7 = vpack.c.bf16 %v58_v6, %v55_v4  ;;  %v61_v11 = vld [vmem:[#allocation5 + $0x30] sm:$0x1]  ;;  %v564_v12 = vpack.c.bf16 %v60_v10, %v57_v9  ;;  %v241_v13 = vld [vmem:[#allocation7 + $0x80] sm:$0xff]  ;;  %v243_v19 = vld [vmem:[#allocation7 + $0x90] sm:$0xff]  ;;  %s705_s24 = scalar_lea.vmem %s445_s23, 128  ;;  %p710_p11 = scmp.lt.s32.totalorder %s445_s23, %s445_s23 }
  0x3b   :  { %560 = vmatprep.subr.bf16.mxu0 %v559_v5  ;;  %v242_v14 = vld [vmem:[#allocation7 + $0x88] sm:$0xff]  ;;  %v225_v15 = vld [vmem:[#allocation7] sm:$0xff]  ;;  %v244_v20 = vld [vmem:[#allocation7 + $0x98] sm:$0xff]  ;;  %p706_p10 = scmp.ne.s32.totalorder %s445_s23, %s705_s24  ;;  %p711_p12 = scmp.lt.s32.totalorder %s705_s24, %s705_s24 }
  0x3c   :  { %562 = vmatpush1.bf16.msra.mxu0 %v561_v7  ;;  %v226_v16 = vld [vmem:[#allocation7 + $0x8] sm:$0xff]  ;;  %v257_v17 = vld [vmem:[#allocation7 + $0x100] sm:$0xff]  ;;  %565 = vmatpush3.bf16.msra.mxu1 %v564_v12  ;;  %v54_v21 = vld [vmem:[#allocation2] sm:$0xff]  ;;  %v566_v23 = vpack.c.bf16 %v242_v14, %v241_v13  ;;  %v570_v26 = vpack.c.bf16 %v244_v20, %v243_v19 }
  0x3d   :  { %454 = vmatprep.subr.msk.mxu0 %vm68_vm1, %v62_v8  ;;  %v258_v18 = vld [vmem:[#allocation7 + $0x108] sm:$0xff]  ;;  %519 = vmatprep.subr.mxu1 %v741_v1  ;;  %v63_v22 = vld [vmem:[#allocation5 + $0x40] sm:$0x1]  ;;  %v568_v24 = vpack.c.bf16 %v226_v16, %v225_v15  ;;  %v227_v27 = vld [vmem:[#allocation7 + $0x10] sm:$0xff]  ;;  %p712_p13 = por %p711_p12, %p710_p11 }
  0x3e   :  { %v599_v25 = vpack.c.bf16 %v258_v18, %v257_v17  ;;  %v228_v28 = vld [vmem:[#allocation7 + $0x18] sm:$0xff]  ;;  %v259_v29 = vld [vmem:[#allocation7 + $0x110] sm:$0xff]  ;;  %v245_v31 = vld [vmem:[#allocation7 + $0xa0] sm:$0xff] }
  0x3f   :  { %v260_v30 = vld [vmem:[#allocation7 + $0x118] sm:$0xff]  ;;  %v246_v32 = vld [vmem:[#allocation7 + $0xa8] sm:$0xff]  ;;  %v572_v33 = vpack.c.bf16 %v228_v28, %v227_v27  ;;  %v229_v36 = vld [vmem:[#allocation7 + $0x20] sm:$0xff]  ;;  %p713_p0 = pnand %p712_p13, %p706_p10 }
  0x40   :  { %455 = vmatpush1.msk.msra.mxu0 %vm68_vm1, %v61_v11  ;;  %520 = vmatpush3.msk.msra.mxu1 %vm68_vm1, %v63_v22  ;;  %v602_v34 = vpack.c.bf16 %v260_v30, %v259_v29  ;;  %v574_v35 = vpack.c.bf16 %v246_v32, %v245_v31  ;;  %v230_v37 = vld [vmem:[#allocation7 + $0x28] sm:$0xff]  ;;  %v261_v38 = vld [vmem:[#allocation7 + $0x120] sm:$0xff]  ;;  %v247_v40 = vld [vmem:[#allocation7 + $0xb0] sm:$0xff] }
  0x41   :  { %456 = vmatmul.mubr.msk.f32.vlgmr.msra.gmra.mrb[0].mxu0 %vm64_vm2, %v54_v21  ;;  %522 = vmatmul.mubr.msk.f32.vlgmr.msra.gmra.mrb[0].mxu1 %vm64_vm2, %v54_v21  ;;  %v262_v39 = vld [vmem:[#allocation7 + $0x128] sm:$0xff]  ;;  %v248_v41 = vld [vmem:[#allocation7 + $0xb8] sm:$0xff]  ;;  %v576_v42 = vpack.c.bf16 %v230_v37, %v229_v36  ;;  %v231_v45 = vld [vmem:[#allocation7 + $0x30] sm:$0xff] }
  0x42   :  { %567 = vmatprep.subr.bf16.mxu0 %v566_v23  ;;  %598 = vmatprep.subr.bf16.mxu1 %v740_v0  ;;  %v605_v43 = vpack.c.bf16 %v262_v39, %v261_v38  ;;  %v578_v44 = vpack.c.bf16 %v248_v41, %v247_v40  ;;  %v232_v46 = vld [vmem:[#allocation7 + $0x38] sm:$0xff]  ;;  %v263_v47 = vld [vmem:[#allocation7 + $0x130] sm:$0xff]  ;;  %v249_v49 = vld [vmem:[#allocation7 + $0xc0] sm:$0xff] }
  0x43   :  { %569 = vmatpush3.bf16.msra.mxu0 %v568_v24  ;;  %600 = vmatpush3.bf16.msra.mxu1 %v599_v25  ;;  %v264_v48 = vld [vmem:[#allocation7 + $0x138] sm:$0xff]  ;;  %v250_v50 = vld [vmem:[#allocation7 + $0xc8] sm:$0xff]  ;;  %v580_v51 = vpack.c.bf16 %v232_v46, %v231_v45  ;;  %v233_v54 = vld [vmem:[#allocation7 + $0x40] sm:$0xff]  ;;  %v413_v45 = vlaneseq }
  0x44   :  { %571 = vmatprep.subr.bf16.mxu0 %v570_v26  ;;  %601 = vmatprep.subr.bf16.mxu1 %v740_v0  ;;  %v608_v52 = vpack.c.bf16 %v264_v48, %v263_v47  ;;  %v582_v53 = vpack.c.bf16 %v250_v50, %v249_v49  ;;  %v234_v55 = vld [vmem:[#allocation7 + $0x48] sm:$0xff]  ;;  %v265_v56 = vld [vmem:[#allocation7 + $0x140] sm:$0xff]  ;;  %v251_v58 = vld [vmem:[#allocation7 + $0xd0] sm:$0xff] }
  0x45   :  { %556 = vmatprep.mubr.msk.f32.mxu1 %vm742_vm0, %v741_v1  ;;  %v266_v57 = vld [vmem:[#allocation7 + $0x148] sm:$0xff]  ;;  %v252_v59 = vld [vmem:[#allocation7 + $0xd8] sm:$0xff]  ;;  %v584_v60 = vpack.c.bf16 %v234_v55, %v233_v54  ;;  %v235_v63 = vld [vmem:[#allocation7 + $0x50] sm:$0xff]  ;;  %v414_v49 = vand.u32 127, %v413_v45 }
  0x46   :  { %v611_v61 = vpack.c.bf16 %v266_v57, %v265_v56  ;;  %v586_v62 = vpack.c.bf16 %v252_v59, %v251_v58  ;;  %v236_v1 = vld [vmem:[#allocation7 + $0x58] sm:$0xff]  ;;  %v267_v2 = vld [vmem:[#allocation7 + $0x150] sm:$0xff]  ;;  %v253_v4 = vld [vmem:[#allocation7 + $0xe0] sm:$0xff] }
  0x47   :  { %573 = vmatpush3.bf16.msra.mxu0 %v572_v33  ;;  %603 = vmatpush3.bf16.msra.mxu1 %v602_v34  ;;  %v268_v3 = vld [vmem:[#allocation7 + $0x158] sm:$0xff]  ;;  %v254_v5 = vld [vmem:[#allocation7 + $0xe8] sm:$0xff]  ;;  %v588_v6 = vpack.c.bf16 %v236_v1, %v235_v63  ;;  %v237_v9 = vld [vmem:[#allocation7 + $0x60] sm:$0xff]  ;;  %vm434_vm4 = vcmp.lt.s32.totalorder %v414_v49, 8  ;;  %vm433_vm5 = vcmp.lt.s32.totalorder %v414_v49, 4 }
  0x48   :  { %575 = vmatprep.subr.bf16.mxu0 %v574_v35  ;;  %604 = vmatprep.subr.bf16.mxu1 %v740_v0  ;;  %v614_v7 = vpack.c.bf16 %v268_v3, %v267_v2  ;;  %v590_v8 = vpack.c.bf16 %v254_v5, %v253_v4  ;;  %v238_v10 = vld [vmem:[#allocation7 + $0x68] sm:$0xff]  ;;  %v269_v12 = vld [vmem:[#allocation7 + $0x160] sm:$0xff]  ;;  %v255_v15 = vld [vmem:[#allocation7 + $0xf0] sm:$0xff] }
  0x49   :  { %v592_v11 = vpack.c.bf16 %v238_v10, %v237_v9  ;;  %v270_v13 = vld [vmem:[#allocation7 + $0x168] sm:$0xff]  ;;  %v256_v16 = vld [vmem:[#allocation7 + $0xf8] sm:$0xff]  ;;  %v239_v18 = vld [vmem:[#allocation7 + $0x70] sm:$0xff] }
  0x4a   :  { %v617_v14 = vpack.c.bf16 %v270_v13, %v269_v12  ;;  %v594_v17 = vpack.c.bf16 %v256_v16, %v255_v15  ;;  %v240_v19 = vld [vmem:[#allocation7 + $0x78] sm:$0xff]  ;;  %v271_v21 = vld [vmem:[#allocation7 + $0x170] sm:$0xff] }
  0x4b   :  { %577 = vmatpush3.bf16.msra.mxu0 %v576_v42  ;;  %606 = vmatpush3.bf16.msra.mxu1 %v605_v43  ;;  %v596_v20 = vpack.c.bf16 %v240_v19, %v239_v18  ;;  %v272_v22 = vld [vmem:[#allocation7 + $0x178] sm:$0xff] }
  0x4c   :  { %579 = vmatprep.subr.bf16.mxu0 %v578_v44  ;;  %607 = vmatprep.subr.bf16.mxu1 %v740_v0  ;;  %v620_v23 = vpack.c.bf16 %v272_v22, %v271_v21 }
  0x4f   :  { %581 = vmatpush3.bf16.msra.mxu0 %v580_v51  ;;  %609 = vmatpush3.bf16.msra.mxu1 %v608_v52 }
  0x50   :  { %583 = vmatprep.subr.bf16.mxu0 %v582_v53  ;;  %610 = vmatprep.subr.bf16.mxu1 %v740_v0 }
  0x53   :  { %585 = vmatpush3.bf16.msra.mxu0 %v584_v60  ;;  %612 = vmatpush3.bf16.msra.mxu1 %v611_v61 }
  0x54   :  { %587 = vmatprep.subr.bf16.mxu0 %v586_v62  ;;  %613 = vmatprep.subr.bf16.mxu1 %v740_v0 }
  0x57   :  { %589 = vmatpush3.bf16.msra.mxu0 %v588_v6  ;;  %615 = vmatpush3.bf16.msra.mxu1 %v614_v7 }
  0x58   :  { %591 = vmatprep.subr.bf16.mxu0 %v590_v8  ;;  %616 = vmatprep.subr.bf16.mxu1 %v740_v0 }
  0x5b   :  { %593 = vmatpush3.bf16.msra.mxu0 %v592_v11  ;;  %618 = vmatpush3.bf16.msra.mxu1 %v617_v14 }
  0x5c   :  { %595 = vmatprep.subr.bf16.mxu0 %v594_v17  ;;  %619 = vmatprep.subr.bf16.mxu1 %v740_v0 }
  0x5f   :  { %597 = vmatpush3.bf16.msra.mxu0 %v596_v20  ;;  %621 = vmatpush3.bf16.msra.mxu1 %v620_v23 }
 0x114   :  { %v144_v24 = vpop.f32.mrb[0].mxu0  ;;  %v215_v27 = vpop.f32.mrb[0].mxu1 }
 0x115   :  { %v219_v25 = vmax.f32 %v144_v24, 0.0  ;;  %v146_v26 = vpop.f32.mrb[1].mxu0  ;;  %v221_v29 = vmax.f32 %v215_v27, 0.0  ;;  %v523_v30 = vpop.f32.mrb[1].mxu1 }
 0x116   :  { %v220_v28 = vmax.f32 %v146_v26, 0.0 }
 0x117   :  { %v224_v32 = vmin.f32 %v221_v29, 6.0  ;;  %v222_v33 = vmin.f32 %v219_v25, 6.0 }
 0x118   :  { %v223_v31 = vmin.f32 %v220_v28, 6.0 }
 0x119   :  { %557 = vmatmul.mubr.f32.vlgmr.msra.gmra.mrb[2].mxu1 %v224_v32 }
 0x11a   :  { %337 = vmatprep.mubr.f32.mxu0 %v223_v31 }
 0x11b   :  { %338 = vmatmul.mubr.f32.vlgmr.msra.gmra.mrb[2].mxu0 %v222_v33 }
 0x1ec   :  { %v409_v34 = vpop.f32.mrb[2].mxu1 }
 0x1ed   :  { %v558_v35 = vpop.f32.mrb[3].mxu1 }
 0x1ee   :  { %v495_v0 = vpop.f32.mrb[2].mxu0 }
 0x1ef   :  { %v496_v36 = vpop.f32.mrb[3].mxu0 }
 0x1f0   :  { %v497_v37 = vadd.f32 %v496_v36, %v495_v0 }
 0x1f2   :  { %v410_v38 = vadd.f32 %v497_v37, %v409_v34 }
 0x1f4   :  { %v418_v39 = vand.u32 2147483647, %v410_v38  ;;  %v417_v52 = vmax.f32 %v410_v38, 0.0 }
 0x1f6   :  { %v419_v40 = vsub.f32 0.0, %v418_v39 }
 0x1f8   :  { %v420_v41 = vmul.f32 1.442695, %v419_v40 }
 0x1fa   :  { %633 = vpow2.f32 %v420_v41 }
 0x204   :  { %v634_v42 = vpop.eup %633 }
 0x205   :  { %v422_v43 = vadd.f32 1.0, %v634_v42  ;;  %v425_v44 = vmul.f32 -0.5, %v634_v42  ;;  %v428_v47 = vand.u32 2147483647, %v634_v42 }
 0x207   :  { %635 = vlog2.f32 %v422_v43  ;;  %v426_v46 = vadd.f32 1.0, %v425_v44  ;;  %vm429_vm3 = vcmp.lt.f32.partialorder %v428_v47, 0.0004427343 }
 0x208   :  { %637 = vtanh.f32 %v410_v38 }
 0x209   :  { %v427_v51 = vmul.f32 %v634_v42, %v426_v46 }
 0x211   :  { %v636_v48 = vpop.eup %635 }
 0x212   :  { %v424_v50 = vmul.f32 0.6931472, %v636_v48  ;;  %v638_v54 = vpop.eup %637 }
 0x213   :  { %v416_v57 = vmul.f32 2.0, %v638_v54 }
 0x214   :  { %v430_v53 = vsel %vm429_vm3, %v427_v51, %v424_v50 }
 0x215   :  { %v431_v55 = vadd.f32 %v430_v53, %v417_v52 }
 0x217   :  { %v432_v56 = vadd.f32 0.001, %v431_v55 }
 0x219   :  { %v435_v58 = vsel %vm434_vm4, %v432_v56, %v410_v38 }
 0x21a   :  { %v436_v59 = vsel %vm433_vm5, %v416_v57, %v435_v58 }
 0x21b   :  { %437 = vst [vmem:[#allocation8] sm:$0xff] %v436_v59 }
 0x21c   :  { %716 = shalt.err (!%p713_p0)
}
 0x21d   :  { %s717_s27 = scalar_lea.hbm %s831_s3, 128 }
 0x21e   :  { %p718_p1 = scmp.ne.s32.totalorder %s831_s3, %s717_s27  ;;  %p721_p2 = scmp.lt.u32.totalorder %s717_s27, %s831_s3 }
 0x220   :  { %p723_p3 = pnand %p721_p2, %p718_p1 }
 0x222   :  { %726 = shalt.err (!%p723_p3)
}
 0x223   :  { %447 = dma.vmem_to_hbm [thread:$0]  %s445_s23, 128, %s831_s3, [#allocation4]  }
 0x224   :  { %731 = dma.done.wait [#allocation4], 128  }
 0x225   :  { %732 = vsyncadd [#allocation4], 4294967168 }
 0x226   :  { %451 = vsyncpa [#allocation3], 1 }
 0x227   :  { %452 = vsyncpa [#allocation6], 1 }
 0x228   :  { %453 = vsyncpa [#allocation4], 1 }

</bundles_post_ra>
